<compile_context>
chip_gen: v6e
topology: v6e:2x2x1
jax: 0.10.0
libtpu: 0.0.40
codegen_flags: <defaults>
</compile_context>

<pallas_src>
import jax
import jax.numpy as jnp
from jax.experimental import pallas as pl
from jax.experimental.pallas import tpu as pltpu

# ---- DilConv config (a typical DARTS-style instantiation of this module) ----
IN_CH = 4
OUT_CH = 8
KH = KW = 3
STRIDE = 1
PADDING = 2
DILATION = 2
COMPUTE_DTYPE = jnp.bfloat16   # MXU operand dtype; accumulation stays f32

# TODO(synk): spectral_norm (spec_norm=True) is a weight re-parameterization
# applied outside the conv; only the plain Conv2d forward path is kernelized.


def dilconv_kernel(xcol_ref, w_ref, o_ref):
    """Single fused im2col matmul with the bias folded into the contraction.

    xcol_ref: (K+1, N*M) bf16  im2col patches + ones row, batch folded on lanes
    w_ref:    (Cout, K+1) bf16 conv weights + bias column
    o_ref:    (Cout, N*M) f32  channels on sublanes, (n, h, w) on lanes
    """
    o_ref[...] = jnp.dot(
        w_ref[...], xcol_ref[...], preferred_element_type=jnp.float32
    ).astype(o_ref.dtype)


def dilconv_forward(x_nchw, w_oihw, bias, *, stride=STRIDE, padding=PADDING,
                    dilation=DILATION):
    """Equivalent of DilConv(...).forward(x) with spec_norm=False (NCHW in/out)."""
    N, Cin, H, W = x_nchw.shape
    Cout, _, kh_taps, kw_taps = w_oihw.shape
    Hout = (H + 2 * padding - dilation * (kh_taps - 1) - 1) // stride + 1
    Wout = (W + 2 * padding - dilation * (kw_taps - 1) - 1) // stride + 1
    M = Hout * Wout
    NM = N * M
    K = kh_taps * kw_taps * Cin
    K1 = K + 1   # +1: ones row folds the bias into the MXU push

    # ---- wrapper glue: pad + im2col; taps*channels on sublanes, (n,h,w) on lanes.
    # allow_input_fusion below lets XLA fuse this producer chain into the
    # pallas_call input instead of materializing x_col separately in HBM.
    x_pad = jnp.pad(
        x_nchw, ((0, 0), (0, 0), (padding, padding), (padding, padding))
    ).astype(COMPUTE_DTYPE)
    rows = []
    for kh in range(kh_taps):
        for kw in range(kw_taps):
            h0 = kh * dilation
            w0 = kw * dilation
            win = x_pad[:, :,
                        h0: h0 + (Hout - 1) * stride + 1: stride,
                        w0: w0 + (Wout - 1) * stride + 1: stride]  # (N,Cin,Hout,Wout)
            rows.append(jnp.transpose(win, (1, 0, 2, 3)).reshape(Cin, NM))
    rows.append(jnp.ones((1, NM), COMPUTE_DTYPE))                  # bias row
    x_col = jnp.concatenate(rows, axis=0)                          # (K1, NM)

    # PyTorch weight (Cout,Cin,KH,KW) -> (Cout,K); column order (kh*KW+kw)*Cin+ci
    # matches x_col's row order.  Bias is appended as the last column.
    w2 = jnp.transpose(w_oihw, (0, 2, 3, 1)).reshape(Cout, K)
    w_aug = jnp.concatenate(
        [w2, bias.reshape(Cout, 1)], axis=1).astype(COMPUTE_DTYPE)  # (Cout, K1)

    # Single grid step: the whole problem (~48 KB bf16 x_col, 16 KB f32 output)
    # trivially fits VMEM on every generation.  TODO(synk): for real DARTS sizes
    # (Cin 64-512, 32x32 maps) tile the NM / K axes against the per-chip VMEM
    # budget (v7x: 64 MiB physical, v5e: 16 MiB default scoped) and set
    # vmem_limit_bytes explicitly.
    out_flat = pl.pallas_call(
        dilconv_kernel,
        out_shape=jax.ShapeDtypeStruct((Cout, NM), x_nchw.dtype),
        grid=(1,),
        in_specs=[
            pl.BlockSpec((K1, NM), lambda i: (0, 0)),
            pl.BlockSpec((Cout, K1), lambda i: (0, 0)),
        ],
        out_specs=pl.BlockSpec((Cout, NM), lambda i: (0, 0)),
        compiler_params=pltpu.CompilerParams(
            dimension_semantics=("arbitrary",),
            allow_input_fusion=[True, False],
        ),
    )(x_col, w_aug)

    # (Cout, N*M) -> (N, Cout, Hout, Wout): free reshape + small wrapper transpose.
    return jnp.transpose(out_flat.reshape(Cout, N, Hout, Wout), (1, 0, 2, 3))


if __name__ == "__main__":
    key = jax.random.PRNGKey(0)
    k_x, k_w, k_b = jax.random.split(key, 3)

    # deterministic "parameters" (shapes match nn.Conv2d(in_ch, out_ch, 3, ...))
    x = jax.random.normal(k_x, (2, IN_CH, 16, 16), dtype=jnp.float32)
    w = jax.random.normal(k_w, (OUT_CH, IN_CH, KH, KW), dtype=jnp.float32) * 0.1
    b = jax.random.normal(k_b, (OUT_CH,), dtype=jnp.float32) * 0.1

    out = jax.jit(dilconv_forward)(x, w, b)
    out = jax.block_until_ready(out)

    def conv_ref(xx, ww, bb):
        return jax.lax.conv_general_dilated(
            xx, ww,
            window_strides=(STRIDE, STRIDE),
            padding=[(PADDING, PADDING), (PADDING, PADDING)],
            rhs_dilation=(DILATION, DILATION),
            dimension_numbers=("NCHW", "OIHW", "NCHW"),
        ) + bb.reshape(1, OUT_CH, 1, 1)

    # Loose check vs. the f32 reference (kernel uses bf16 operands, f32 accumulate).
    ref_f32 = conv_ref(x, w, b)
    assert out.shape == ref_f32.shape, (out.shape, ref_f32.shape)
    err_f32 = float(jnp.max(jnp.abs(out - ref_f32)))
    assert err_f32 < 5e-2, err_f32

    # Tight check vs. a reference computed from bf16-rounded inputs.
    to_bf = lambda t: t.astype(jnp.bfloat16).astype(jnp.float32)
    ref_bf = conv_ref(to_bf(x), to_bf(w), to_bf(b))
    err_bf = float(jnp.max(jnp.abs(out - ref_bf)))
    assert err_bf < 5e-3, err_bf

    print("KERNEL_OK")
</pallas_src>

<mosaic_0001>
module attributes {stable_mosaic.version = 11 : i64} {
  func.func @dilconv_kernel(%arg0: i32, %arg1: memref<37x512xbf16, #tpu.memory_space<vmem>>, %arg2: memref<8x37xbf16, #tpu.memory_space<vmem>>, %arg3: memref<8x512xf32, #tpu.memory_space<vmem>>) attributes {dimension_semantics = [#tpu.dimension_semantics<arbitrary>], iteration_bounds = array<i64: 1>, scalar_prefetch = 0 : i64, scratch_operands = 0 : i64, tpu.core_type = #tpu.core_type<tc>, window_params = [{pipeline_mode = #tpu.pipeline_mode<synchronous>, transform_indices = @transform_0, window_bounds = array<i64: 37, 512>}, {pipeline_mode = #tpu.pipeline_mode<synchronous>, transform_indices = @transform_1, window_bounds = array<i64: 8, 37>}, {pipeline_mode = #tpu.pipeline_mode<synchronous>, transform_indices = @transform_2, window_bounds = array<i64: 8, 512>}]} {
    %c0 = arith.constant 0 : index
    %c0_0 = arith.constant 0 : index
    %0 = vector.load %arg2[%c0, %c0_0] : memref<8x37xbf16, #tpu.memory_space<vmem>>, vector<8x37xbf16>
    %c0_1 = arith.constant 0 : index
    %c0_2 = arith.constant 0 : index
    %1 = vector.load %arg1[%c0_1, %c0_2] : memref<37x512xbf16, #tpu.memory_space<vmem>>, vector<37x512xbf16>
    %cst = arith.constant dense<0.000000e+00> : vector<8x512xf32>
    %2 = tpu.matmul %0, %1, %cst {dimension_numbers = #tpu.dot_dimension_numbers<[1], [0], [0], [1], [0, 0, 1, 1], [], []>} : vector<8x37xbf16>, vector<37x512xbf16>, vector<8x512xf32> -> vector<8x512xf32>
    %c0_3 = arith.constant 0 : index
    %c0_4 = arith.constant 0 : index
    %3 = vector.load %arg3[%c0_3, %c0_4] : memref<8x512xf32, #tpu.memory_space<vmem>>, vector<8x512xf32>
    tpu.vector_store %arg3[%c0_3, %c0_4], %2 {strides = array<i32>} : memref<8x512xf32, #tpu.memory_space<vmem>>, vector<8x512xf32>,
    return
  }
  func.func @transform_0(%arg0: i32) -> (i32, i32) {
    %c0_i32 = arith.constant 0 : i32
    %c0_i32_0 = arith.constant 0 : i32
    %c0_i32_1 = arith.constant 0 : i32
    return %c0_i32, %c0_i32_0 : i32, i32
  }
  func.func @transform_1(%arg0: i32) -> (i32, i32) {
    %c0_i32 = arith.constant 0 : i32
    %c0_i32_0 = arith.constant 0 : i32
    %c0_i32_1 = arith.constant 0 : i32
    return %c0_i32, %c0_i32_0 : i32, i32
  }
  func.func @transform_2(%arg0: i32) -> (i32, i32) {
    %c0_i32 = arith.constant 0 : i32
    %c0_i32_0 = arith.constant 0 : i32
    %c0_i32_1 = arith.constant 0 : i32
    return %c0_i32, %c0_i32_0 : i32, i32
  }
}

</mosaic_0001>

<bundles_post_ra>
// kernel: dilconv_forward.1
= control target key start
LH: loop header
LB: loop body
LE: loop exit
PB: predicated region body
PF: predicated region fallthrough
CT: control target
= control target key end

     0   :  { %vm77_vm0 = vcmask 1041408   ;;  %vm78_vm1 = vcmask 1042432   ;;  %v215_v1 = vmov 65535   ;;  %v216_v4 = vmov 0   ;;  %s277_s0 = inlined_call_operand.vmem [shape: bf16[37,512], index: 0, kind: input, shape index: {}]   ;;  %s278_s1 = inlined_call_operand.vmem [shape: bf16[8,37], index: 1, kind: input, shape index: {}]   ;;  %s279_s2 = inlined_call_operand.vmem [shape: f32[8,512], index: 2, kind: output, shape index: {}]  }
   0x1   :  { %v21_v0 = vld [vmem:[%s277_s0 + $0x40] sm:$0x77]  ;;  %v79_v2 = vsel %vm77_vm0, 4294967295, %v215_v1  ;;  %v22_v3 = vld [vmem:[%s277_s0 + $0x48] sm:$0x77]  ;;  %125 = vmatprep.mubr.bf16.mxu0 %v216_v4  ;;  %166 = vmatprep.mubr.bf16.mxu1 %v216_v4  ;;  %vm73_vm2 = vcmask 302080  }
   0x2   :  { %v192_v5 = vcombine.high %v21_v0, %v21_v0  ;;  %v80_v6 = vsel %vm78_vm1, %v79_v2, 0  ;;  %v194_v7 = vcombine.high %v22_v3, %v22_v3  ;;  %v191_v8 = vcombine.low %v21_v0, %v21_v0  ;;  %v203_v10 = vld [vmem:[%s277_s0 + $0x24] ss:$16 sps:$4 sm:$0xff]   ;;  %v205_v14 = vld [vmem:[%s277_s0 + $0x2c] ss:$16 sps:$4 sm:$0xff]  }
   0x3   :  { %v193_v9 = vcombine.low %v22_v3, %v22_v3  ;;  %v207_v16 = vld [vmem:[%s277_s0 + $0x20] ss:$16 sps:$4 sm:$0xff]   ;;  %v208_v17 = vld [vmem:[%s277_s0 + $0x28] ss:$16 sps:$4 sm:$0xff]   ;;  %v209_v18 = vld [vmem:[%s277_s0 + $0x4] ss:$16 sps:$4 sm:$0xff]  }
   0x4   :  { %v85_v11 = vand.u32 %v192_v5, %v80_v6  ;;  %v91_v12 = vand.u32 %v194_v7, %v80_v6  ;;  %v82_v13 = vand.u32 %v191_v8, %v80_v6  ;;  %v211_v19 = vld [vmem:[%s277_s0 + $0xc] ss:$16 sps:$4 sm:$0xff]   ;;  %v213_v20 = vld [vmem:[%s277_s0] ss:$16 sps:$4 sm:$0xff]   ;;  %v214_v21 = vld [vmem:[%s277_s0 + $0x8] ss:$16 sps:$4 sm:$0xff]  }
   0x5   :  { %v88_v15 = vand.u32 %v193_v9, %v80_v6  ;;  %v12_v22 = vld [vmem:[%s278_s1] sm:$0xf] }
   0x6   :  { %103 = vmatprep.subr.bf16.mxu0 %v85_v11  ;;  %144 = vmatprep.subr.bf16.mxu1 %v91_v12 }
   0x7   :  { %104 = vmatpush1.bf16.msra.mxu0 %v82_v13  ;;  %145 = vmatpush1.bf16.msra.mxu1 %v88_v15 }
   0x8   :  { %105 = vmatprep.subr.bf16.mxu0 %v203_v10  ;;  %146 = vmatprep.subr.bf16.mxu1 %v205_v14 }
   0xb   :  { %106 = vmatpush1.bf16.msra.mxu0 %v207_v16  ;;  %147 = vmatpush1.bf16.msra.mxu1 %v208_v17 }
   0xc   :  { %107 = vmatprep.subr.bf16.mxu0 %v209_v18  ;;  %148 = vmatprep.subr.bf16.mxu1 %v211_v19 }
   0xf   :  { %108 = vmatpush1.bf16.msra.mxu0 %v213_v20  ;;  %149 = vmatpush1.bf16.msra.mxu1 %v214_v21 }
  0x12   :  { %195 = vmatmul.mubr.msk.bf16.vlgmr.msra.gmra.mxu0 %vm73_vm2, %v12_v22  ;;  %196 = vmatmul.mubr.msk.bf16.vlgmr.msra.gmra.mxu1 %vm73_vm2, %v12_v22 }
  0xd2   :  { %v127_v23 = vpop.f32.mrf.mxu0  ;;  %v168_v24 = vpop.f32.mrf.mxu1 }
  0xd3   :  { %175 = vst [vmem:[%s279_s2] sm:$0xff] %v127_v23  ;;  %177 = vst [vmem:[%s279_s2 + $0x10] sm:$0xff] %v168_v24 }
  0xd4   :  { %v129_v25 = vpop.f32.mrf.mxu0  ;;  %v170_v26 = vpop.f32.mrf.mxu1 }
  0xd5   :  { %176 = vst [vmem:[%s279_s2 + $0x8] sm:$0xff] %v129_v25  ;;  %178 = vst [vmem:[%s279_s2 + $0x18] sm:$0xff] %v170_v26 }
  0xd6   :  { %v131_v27 = vpop.f32.mrf.mxu0  ;;  %v172_v28 = vpop.f32.mrf.mxu1 }
  0xd8   :  { %v132_v29 = vpop.f32.mrf.mxu0  ;;  %v173_v30 = vpop.f32.mrf.mxu1 }

</bundles_post_ra>
